<compile_context>
chip_gen: v7x
topology: tpu7x:2x2x1
jax: 0.10.0
libtpu: 0.0.40
codegen_flags: <defaults>
</compile_context>

<pallas_src>
import functools

import jax
import jax.numpy as jnp
from jax.experimental import pallas as pl
from jax.experimental.pallas import tpu as pltpu

MARGIN = 2.0
_PAIRWISE_EPS = 1e-6  # torch.nn.functional.pairwise_distance default eps


def _round_up(x, m):
    return ((x + m - 1) // m) * m


def _choose_block_rows(batch, feat, itemsize=4):
    """Largest row tile <= 512 keeping 2 inputs x 2 pipeline buffers within ~8 MiB."""
    tb = min(512, _round_up(batch, 8))
    bytes_per_row = 2 * 2 * feat * itemsize        # 2 inputs, double-buffered
    budget_rows = (8 * 1024 * 1024) // max(1, bytes_per_row)
    budget_rows = max(8, (budget_rows // 8) * 8)   # keep it a sublane multiple
    return max(8, min(tb, budget_rows))


def _contrastive_loss_kernel(o1_ref, o2_ref, lbl_ref, out_ref, *,
                             batch, block_rows, margin):
    o1 = o1_ref[...].astype(jnp.float32)           # (TB, D)
    o2 = o2_ref[...].astype(jnp.float32)           # (TB, D)
    lbl = lbl_ref[...].astype(jnp.float32)         # (TB, 1)

    diff = o1 - o2 + jnp.float32(_PAIRWISE_EPS)    # torch adds eps to the difference
    d2 = jnp.sum(diff * diff, axis=1, keepdims=True)   # (TB, 1) squared distance
    d = jnp.sqrt(d2)                               # needed only for the margin branch

    pos = lbl * d2                                 # label * d^2 (no sqrt round-trip)
    neg = (1.0 - lbl) * jnp.square(jnp.maximum(jnp.float32(margin) - d, 0.0))
    per_row = pos + neg                            # (TB, 1)

    # Mask rows past the true batch size (tail-tile padding contributes garbage).
    row0 = pl.program_id(0) * block_rows
    row_ids = row0 + jax.lax.broadcasted_iota(jnp.int32, per_row.shape, 0)
    per_row = jnp.where(row_ids < batch, per_row, 0.0)

    inv_b = jnp.float32(1.0 / batch)               # global-B mean scaling, compile-time
    partial = jnp.sum(per_row, axis=0, keepdims=True) * inv_b   # (1, 1)

    # Lane-dense partial-sum slab (unmasked vst); wrapper picks lane 0 of each slab.
    out_ref[...] = jnp.broadcast_to(partial, out_ref.shape)


def contrastive_loss(output1, output2, label, margin=MARGIN):
    """output1, output2: (B, D); label: (B, 1). Returns scalar mean contrastive loss."""
    B, D = output1.shape
    assert output2.shape == (B, D)
    assert label.shape == (B, 1)

    tb = _choose_block_rows(B, D)
    num_tiles = -(-B // tb)

    kernel = functools.partial(
        _contrastive_loss_kernel, batch=B, block_rows=tb, margin=float(margin))

    out = pl.pallas_call(
        kernel,
        out_shape=jax.ShapeDtypeStruct((1, 128 * num_tiles), jnp.float32),
        grid=(num_tiles,),
        in_specs=[
            pl.BlockSpec((tb, D), lambda i: (i, 0)),
            pl.BlockSpec((tb, D), lambda i: (i, 0)),
            pl.BlockSpec((tb, 1), lambda i: (i, 0)),
        ],
        out_specs=pl.BlockSpec((1, 128), lambda i: (0, i)),
        compiler_params=pltpu.CompilerParams(
            dimension_semantics=("parallel",)),
    )(output1, output2, label)

    partials = out.reshape(num_tiles, 128)[:, 0]   # one lane per tile
    return jnp.sum(partials)


def _reference_loss(output1, output2, label, margin=MARGIN):
    diff = output1.astype(jnp.float32) - output2.astype(jnp.float32) + _PAIRWISE_EPS
    d = jnp.sqrt(jnp.sum(diff * diff, axis=1, keepdims=True))
    loss = label * (d ** 2) + (1.0 - label) * jnp.clip(margin - d, 0.0, None) ** 2
    return jnp.mean(loss)


if __name__ == "__main__":
    key = jax.random.PRNGKey(0)
    k1, k2, k3 = jax.random.split(key, 3)

    B, D = 8, 32
    output1 = jax.random.normal(k1, (B, D), dtype=jnp.float32)
    output2 = jax.random.normal(k2, (B, D), dtype=jnp.float32)
    # Binary similar/dissimilar labels, shape (B, 1) as used with keepdim=True distances.
    label = jax.random.bernoulli(k3, p=0.5, shape=(B, 1)).astype(jnp.float32)

    loss = contrastive_loss(output1, output2, label)
    loss = jax.block_until_ready(loss)

    ref = _reference_loss(output1, output2, label)
    assert jnp.allclose(loss, ref, rtol=1e-5, atol=1e-5), (loss, ref)

    print("KERNEL_OK")
</pallas_src>

<mosaic_0001>
module attributes {stable_mosaic.version = 11 : i64} {
  func.func @_contrastive_loss_kernel(%arg0: i32, %arg1: memref<8x32xf32, #tpu.memory_space<vmem>>, %arg2: memref<8x32xf32, #tpu.memory_space<vmem>>, %arg3: memref<8x1xf32, #tpu.memory_space<vmem>>, %arg4: memref<1x128xf32, #tpu.memory_space<vmem>>) attributes {dimension_semantics = [#tpu.dimension_semantics<parallel>], iteration_bounds = array<i64: 1>, scalar_prefetch = 0 : i64, scratch_operands = 0 : i64, tpu.core_type = #tpu.core_type<tc>, window_params = [{transform_indices = @transform_0, window_bounds = array<i64: 8, 32>}, {transform_indices = @transform_1, window_bounds = array<i64: 8, 32>}, {transform_indices = @transform_2, window_bounds = array<i64: 8, 1>}, {transform_indices = @transform_3, window_bounds = array<i64: 1, 128>}]} {
    %c0 = arith.constant 0 : index
    %c0_0 = arith.constant 0 : index
    %0 = vector.load %arg1[%c0, %c0_0] : memref<8x32xf32, #tpu.memory_space<vmem>>, vector<8x32xf32>
    %c0_1 = arith.constant 0 : index
    %c0_2 = arith.constant 0 : index
    %1 = vector.load %arg2[%c0_1, %c0_2] : memref<8x32xf32, #tpu.memory_space<vmem>>, vector<8x32xf32>
    %c0_3 = arith.constant 0 : index
    %c0_4 = arith.constant 0 : index
    %2 = vector.load %arg3[%c0_3, %c0_4] : memref<8x1xf32, #tpu.memory_space<vmem>>, vector<8x1xf32>
    %3 = arith.subf %0, %1 : vector<8x32xf32>
    %cst = arith.constant 9.99999997E-7 : f32
    %4 = vector.broadcast %cst : f32 to vector<8x32xf32>
    %5 = arith.addf %3, %4 : vector<8x32xf32>
    %6 = arith.mulf %5, %5 : vector<8x32xf32>
    %cst_5 = arith.constant dense<0.000000e+00> : vector<8xf32>
    %7 = vector.multi_reduction <add>, %6, %cst_5 [1] : vector<8x32xf32> to vector<8xf32>
    %8 = vector.shape_cast %7 : vector<8xf32> to vector<8x1xf32>
    %9 = math.sqrt %8 : vector<8x1xf32>
    %10 = arith.mulf %2, %8 : vector<8x1xf32>
    %cst_6 = arith.constant 1.000000e+00 : f32
    %11 = vector.broadcast %cst_6 : f32 to vector<8x1xf32>
    %12 = arith.subf %11, %2 : vector<8x1xf32>
    %cst_7 = arith.constant 2.000000e+00 : f32
    %13 = vector.broadcast %cst_7 : f32 to vector<8x1xf32>
    %14 = arith.subf %13, %9 : vector<8x1xf32>
    %cst_8 = arith.constant 0.000000e+00 : f32
    %15 = vector.broadcast %cst_8 : f32 to vector<8x1xf32>
    %16 = arith.maximumf %14, %15 : vector<8x1xf32>
    %17 = arith.mulf %16, %16 : vector<8x1xf32>
    %18 = arith.mulf %12, %17 : vector<8x1xf32>
    %19 = arith.addf %10, %18 : vector<8x1xf32>
    %c8_i32 = arith.constant 8 : i32
    %20 = arith.muli %arg0, %c8_i32 : i32
    %21 = tpu.iota {dimensions = array<i32: 0>} : vector<8x1xi32>
    %22 = vector.broadcast %20 : i32 to vector<8x1xi32>
    %23 = arith.addi %22, %21 : vector<8x1xi32>
    %c8_i32_9 = arith.constant 8 : i32
    %24 = vector.broadcast %c8_i32_9 : i32 to vector<8x1xi32>
    %25 = arith.cmpi slt, %23, %24 : vector<8x1xi32>
    %cst_10 = arith.constant 0.000000e+00 : f32
    %26 = vector.broadcast %cst_10 : f32 to vector<8x1xf32>
    %27 = arith.select %25, %19, %26 : vector<8x1xi1>, vector<8x1xf32>
    %cst_11 = arith.constant dense<0.000000e+00> : vector<1xf32>
    %28 = vector.multi_reduction <add>, %27, %cst_11 [0] : vector<8x1xf32> to vector<1xf32>
    %29 = vector.shape_cast %28 : vector<1xf32> to vector<1x1xf32>
    %cst_12 = arith.constant 1.250000e-01 : f32
    %30 = vector.broadcast %cst_12 : f32 to vector<1x1xf32>
    %31 = arith.mulf %29, %30 : vector<1x1xf32>
    %32 = vector.shape_cast %31 : vector<1x1xf32> to vector<1x1xf32>
    %33 = vector.broadcast %32 : vector<1x1xf32> to vector<1x128xf32>
    %c0_13 = arith.constant 0 : index
    %c0_14 = arith.constant 0 : index
    %34 = vector.load %arg4[%c0_13, %c0_14] : memref<1x128xf32, #tpu.memory_space<vmem>>, vector<1x128xf32>
    tpu.vector_store %arg4[%c0_13, %c0_14], %33 {strides = array<i32>} : memref<1x128xf32, #tpu.memory_space<vmem>>, vector<1x128xf32>,
    return
  }
  func.func @transform_0(%arg0: i32) -> (i32, i32) {
    %c0_i32 = arith.constant 0 : i32
    %c0_i32_0 = arith.constant 0 : i32
    return %arg0, %c0_i32 : i32, i32
  }
  func.func @transform_1(%arg0: i32) -> (i32, i32) {
    %c0_i32 = arith.constant 0 : i32
    %c0_i32_0 = arith.constant 0 : i32
    return %arg0, %c0_i32 : i32, i32
  }
  func.func @transform_2(%arg0: i32) -> (i32, i32) {
    %c0_i32 = arith.constant 0 : i32
    %c0_i32_0 = arith.constant 0 : i32
    return %arg0, %c0_i32 : i32, i32
  }
  func.func @transform_3(%arg0: i32) -> (i32, i32) {
    %c0_i32 = arith.constant 0 : i32
    %c0_i32_0 = arith.constant 0 : i32
    return %c0_i32, %arg0 : i32, i32
  }
}

</mosaic_0001>

<bundles_post_ra>
// kernel: tpu_custom_call.1
= control target key start
LH: loop header
LB: loop body
LE: loop exit
PB: predicated region body
PF: predicated region fallthrough
CT: control target
= control target key end

     0   :  { %8 = vsyncpa [#allocation3], 0  ;;  %s195_s0 = inlined_call_operand.vmem [shape: f32[8,32], index: 0, kind: input, shape index: {}]   ;;  %s196_s1 = inlined_call_operand.hbm [shape: f32[8,32], index: 1, kind: input, shape index: {}]   ;;  %s197_s2 = inlined_call_operand.vmem [shape: f32[8,1], index: 2, kind: input, shape index: {}]   ;;  %s198_s3 = inlined_call_operand.hbm [shape: f32[1,128], index: 3, kind: output, shape index: {}]  }
   0x1   :  { %9 = vsyncpa [#allocation4], 0  ;;  %s142_s12 = smov [#allocation2]   ;;  %s94_s16 = scalar_lea.hbm %s196_s1, 128 }
   0x2   :  { %s18_s13 = sshll.u32 %s142_s12, 4  ;;  %p95_p0 = scmp.ne.s32.totalorder %s196_s1, %s94_s16  ;;  %s19_s13 = int_to_ptr.vmem [resolvable:$true] %s18_s13 }
   0x3   :  { %p98_p1 = scmp.lt.u32.totalorder %s94_s16, %s196_s1 }
   0x5   :  { %p100_p2 = pnand %p98_p1, %p95_p0 }
   0x7   :  { %103 = shalt.err (!%p100_p2)
}
   0x8   :  { %s104_s21 = scalar_lea.vmem %s19_s13, 128  ;;  %p109_p4 = scmp.lt.s32.totalorder %s19_s13, %s19_s13 }
   0x9   :  { %p105_p3 = scmp.ne.s32.totalorder %s19_s13, %s104_s21  ;;  %p110_p5 = scmp.lt.s32.totalorder %s104_s21, %s104_s21 }
   0xb   :  { %p111_p6 = por %p110_p5, %p109_p4 }
   0xd   :  { %p112_p7 = pnand %p111_p6, %p105_p3 }
   0xf   :  { %115 = shalt.err (!%p112_p7)
}
  0x10   :  { %21 = dma.hbm_to_vmem [thread:$0]  %s196_s1, 128, %s19_s13, [#allocation3]  }
  0x11   :  { %138 = dma.done.wait [#allocation3], 128  }
  0x12   :  { %139 = vsyncadd [#allocation3], 4294967168  ;;  %v27_v0 = vld [vmem:[%s195_s0] sm:$0xff]  ;;  %vm33_vm0 = vcmask 261120   ;;  %v143_v6 = vmov 0   ;;  %vm58_vm3 = vcmask 7168  }
  0x13   :  { %v28_v1 = vld [vmem:[#allocation2] sm:$0xff]  ;;  %91 = vset.pattern.permute.xlu0 %v143_v6  ;;  %s144_s26 = smov [#allocation5]  }
  0x14   :  { %v30_v2 = vsub.f32 %v27_v0, %v28_v1  ;;  %v29_v14 = vld [vmem:[%s197_s2] sm:$0xff]  ;;  %s79_s27 = sshll.u32 %s144_s26, 4  ;;  %s80_s27 = int_to_ptr.vmem [resolvable:$true] %s79_s27 }
  0x15   :  { %v45_v15 = vsub.f32 1.0, %v29_v14  ;;  %s116_s2 = scalar_lea.vmem %s80_s27, 16  ;;  %s120_s28 = scalar_lea.vmem %s80_s27, 32 }
  0x16   :  { %v31_v3 = vadd.f32 1e-06, %v30_v2  ;;  %p117_p8 = scmp.ne.s32.totalorder %s80_s27, %s116_s2  ;;  %p121_p9 = scmp.lt.s32.totalorder %s80_s27, %s80_s27 }
  0x17   :  { %p122_p10 = scmp.lt.s32.totalorder %s120_s28, %s116_s2 }
  0x18   :  { %v32_v4 = vmul.f32 %v31_v3, %v31_v3 }
  0x19   :  { %p123_p11 = por %p122_p10, %p121_p9 }
  0x1a   :  { %v34_v5 = vsel %vm33_vm0, %v32_v4, 0.0 }
  0x1b   :  { %35 = vadd.xlane.f32.xlu0 %v34_v5  ;;  %p124_p12 = pnand %p123_p11, %p117_p8 }
  0xa8   :  { %v36_v7 = vpop.xlane.xlu0 %35 }
  0xa9   :  { %92 = vrsqrt.f32 %v36_v7  ;;  %vm39_vm1 = vcmp.eq.f32.partialorder %v36_v7, inf  ;;  %v42_v10 = vand.u32 2147483648, %v36_v7  ;;  %vm41_vm2 = vcmp.eq.f32.partialorder %v36_v7, 0.0 }
  0xaa   :  { %v44_v18 = vmul.f32 %v36_v7, %v29_v14 }
  0xb3   :  { %v93_v8 = vpop.eup %92 }
  0xb4   :  { %v38_v9 = vmul.f32 %v93_v8, %v36_v7 }
  0xb6   :  { %v40_v11 = vsel %vm39_vm1, %v36_v7, %v38_v9 }
  0xb7   :  { %v43_v12 = vsel %vm41_vm2, %v42_v10, %v40_v11 }
  0xb8   :  { %v46_v13 = vsub.f32 2.0, %v43_v12 }
  0xba   :  { %v47_v16 = vmax.f32 %v46_v13, 0.0 }
  0xbc   :  { %v48_v17 = vmul.f32 %v47_v16, %v47_v16 }
  0xbe   :  { %v49_v19 = vmul.f32 %v48_v17, %v45_v15 }
  0xc0   :  { %v50_v20 = vadd.f32 %v49_v19, %v44_v18 }
  0xc2   :  { %v59_v21 = vsel %vm58_vm3, %v50_v20, 0.0 }
  0xc3   :  { %v60_v22 = vrot.slane %v59_v21, 4 }
  0xc5   :  { %v61_v23 = vadd.f32 %v60_v22, %v59_v21 }
  0xc7   :  { %v62_v24 = vrot.slane %v61_v23, 2 }
  0xc9   :  { %v63_v25 = vadd.f32 %v62_v24, %v61_v23 }
  0xcb   :  { %v64_v26 = vrot.slane %v63_v25, 1 }
  0xcd   :  { %v65_v27 = vadd.f32 %v64_v26, %v63_v25 }
  0xcf   :  { %v66_v28 = vmul.f32 0.125, %v65_v27 }
  0xd1   :  { %69 = vperm.xlu0 %91, %v66_v28  }
 0x150   :  { %v70_v29 = vpop.permute.xlu0 %69 }
 0x151   :  { %72 = vst [vmem:[#allocation5] sm:$0x1] %v70_v29 }
 0x152   :  { %127 = shalt.err (!%p124_p12)
}
 0x153   :  { %s128_s4 = scalar_lea.hbm %s198_s3, 16 }
 0x154   :  { %p129_p13 = scmp.ne.s32.totalorder %s198_s3, %s128_s4  ;;  %p132_p0 = scmp.lt.u32.totalorder %s128_s4, %s198_s3 }
 0x156   :  { %p134_p1 = pnand %p132_p0, %p129_p13 }
 0x158   :  { %137 = shalt.err (!%p134_p1)
}
 0x159   :  { %82 = dma.vmem_to_hbm [thread:$0]  %s80_s27, 16, %s198_s3, [#allocation4]  }
 0x15a   :  { %140 = dma.done.wait [#allocation4], 16  }
 0x15b   :  { %141 = vsyncadd [#allocation4], 4294967280 }
 0x15c   :  { %86 = vsyncpa [#allocation3], 1 }
 0x15d   :  { %87 = vsyncpa [#allocation4], 1 }

</bundles_post_ra>
